<compile_context>
chip_gen: v7x
topology: tpu7x:2x2x1
jax: 0.10.0
libtpu: 0.0.40
codegen_flags: <defaults>
</compile_context>

<pallas_src>
import math
from functools import partial

import jax
import jax.numpy as jnp
from jax.experimental import pallas as pl
from jax.experimental.pallas import tpu as pltpu


def _drop_path_kernel(keep_ref, x_ref, o_ref, *, inv_keep_prob):
    """One (1, tr, tc) tile of one sample: scale by 1/keep_prob or zero it."""
    b = pl.program_id(0)
    keep = keep_ref[b]                       # SMEM scalar read, value in {0, 1}

    @pl.when(keep != 0)
    def _():
        # Native-dtype multiply (no f32 upcast) by a compile-time constant.
        o_ref[...] = x_ref[...] * jnp.asarray(inv_keep_prob, dtype=o_ref.dtype)

    @pl.when(keep == 0)
    def _():
        # Dropped sample: write zeros; the (aliased) input tile is never read.
        o_ref[...] = jnp.zeros_like(o_ref)


def _x_index_map(b, r, c, keep_ref):
    # Dropped samples (keep == 0) alias input block (0, 0, 0) on every step:
    # Pallas skips the input DMA when the block index is unchanged between
    # consecutive grid steps, so dropped samples cost ~zero HBM read traffic.
    k = keep_ref[b]
    return (b * k, r * k, c * k)


def _o_index_map(b, r, c, keep_ref):
    return (b, r, c)


def _choose_feature_layout(F, *, lane_cap=1024, min_rows=8):
    """Split F = R * C with C a multiple of 128 (lane-dense) and R >= min_rows
    (full sublane fill) when possible; prefer the largest such C <= lane_cap."""
    cands = [c for c in range(128, min(F, lane_cap) + 1, 128) if F % c == 0]
    if not cands:
        return 1, F          # no multiple-of-128 divisor: rare fallback path
    good = [c for c in cands if F // c >= min_rows]
    C = max(good) if good else max(cands)
    return F // C, C


def drop_path(x, key, *, dropout=0.0, training=True, tr_cap=256, tc_cap=1024):
    """Stochastic-depth DropPath matching the PyTorch module's forward."""
    if not (0.0 < dropout < 1.0) or not training:
        return x  # identity path (eval mode / degenerate dropout)
    # TODO(synk): a tiny-input bypass (plain XLA) would avoid the fixed
    # pallas_call step overhead for sub-100 KiB tensors; irrelevant at scale.

    keep_prob = 1.0 - dropout
    orig_shape = x.shape
    B = orig_shape[0]
    F = int(math.prod(orig_shape[1:]))

    # Per-sample lane-dense 2-D view: (B, F) -> (B, R, C).
    R, C = _choose_feature_layout(F)
    x3 = x.reshape(B, R, C)

    # Per-sample keep bits; same semantics as torch.rand + floor(keep_prob + r).
    rand = jax.random.uniform(key, (B,), dtype=jnp.float32)
    keep = jnp.floor(keep_prob + rand).astype(jnp.int32)        # {0, 1}

    # Tile sizes: full dim when it fits the cap, else (8 / 128)-aligned tiles
    # with a cdiv grid (padded tail block).  <= 1 MiB f32 per buffer.
    tr = R if R <= tr_cap else tr_cap        # tr_cap is a multiple of 8
    tc = C if C <= tc_cap else tc_cap        # tc_cap is a multiple of 128
    grid = (B, pl.cdiv(R, tr), pl.cdiv(C, tc))

    out3 = pl.pallas_call(
        partial(_drop_path_kernel, inv_keep_prob=1.0 / keep_prob),
        out_shape=jax.ShapeDtypeStruct((B, R, C), x.dtype),
        grid_spec=pltpu.PrefetchScalarGridSpec(
            num_scalar_prefetch=1,             # `keep` lands in SMEM
            grid=grid,
            in_specs=[pl.BlockSpec((1, tr, tc), _x_index_map)],
            out_specs=pl.BlockSpec((1, tr, tc), _o_index_map),
        ),
        compiler_params=pltpu.CompilerParams(
            dimension_semantics=("parallel", "parallel", "parallel"),
        ),
    )(keep, x3)
    return out3.reshape(orig_shape)


if __name__ == "__main__":
    # Small shapes consistent with DropPath's usage: NCHW feature maps.
    batch, channels, spatial = 2, 4, 16
    dropout = 0.5
    keep_prob = 1.0 - dropout

    key = jax.random.PRNGKey(0)
    kx, kd = jax.random.split(key)
    x = jax.random.normal(kx, (batch, channels, spatial, spatial), dtype=jnp.float32)

    # Training path (stochastic): run the Pallas kernel.
    y = drop_path(x, kd, dropout=dropout, training=True)
    y = jax.block_until_ready(y)
    assert y.shape == x.shape

    # Reference: recompute the same per-sample randoms (same key) in plain JAX.
    rand_ref = jax.random.uniform(kd, (batch,), dtype=jnp.float32)
    mask_ref = jnp.floor(keep_prob + rand_ref).reshape(batch, 1, 1, 1)
    y_ref = (x / keep_prob) * mask_ref
    assert jnp.allclose(y, y_ref, atol=1e-6, rtol=1e-6)

    # Per-sample semantics: dropped samples are exactly zero, kept samples are
    # exactly x / keep_prob (non-vacuous check).
    keep_bits = jnp.floor(keep_prob + rand_ref) > 0.0
    for i in range(batch):
        if bool(keep_bits[i]):
            assert jnp.allclose(y[i], x[i] / keep_prob, atol=1e-6, rtol=1e-6)
        else:
            assert bool(jnp.all(y[i] == 0.0))

    # Eval / identity paths must return the input unchanged (no kernel).
    assert jnp.array_equal(drop_path(x, kd, dropout=dropout, training=False), x)
    assert jnp.array_equal(drop_path(x, kd, dropout=0.0, training=True), x)

    print("KERNEL_OK")
</pallas_src>

<mosaic_0001>
module attributes {stable_mosaic.version = 11 : i64} {
  func.func @_drop_path_kernel(%arg0: i32, %arg1: i32, %arg2: i32, %arg3: memref<2xi32, #tpu.memory_space<smem>>, %arg4: memref<1x8x128xf32, #tpu.memory_space<vmem>>, %arg5: memref<1x8x128xf32, #tpu.memory_space<vmem>>) attributes {dimension_semantics = [#tpu.dimension_semantics<parallel>, #tpu.dimension_semantics<parallel>, #tpu.dimension_semantics<parallel>], iteration_bounds = array<i64: 2, 1, 1>, scalar_prefetch = 1 : i64, scratch_operands = 0 : i64, tpu.core_type = #tpu.core_type<tc>, window_params = [{transform_indices = @transform_0, window_bounds = array<i64: 1, 8, 128>}, {transform_indices = @transform_1, window_bounds = array<i64: 1, 8, 128>}]} {
    %0 = arith.index_cast %arg0 : i32 to index
    %1 = memref.load %arg3[%0] : memref<2xi32, #tpu.memory_space<smem>>
    %c0_i32 = arith.constant 0 : i32
    %2 = arith.cmpi ne, %1, %c0_i32 : i32
    %3 = arith.extui %2 : i1 to i32
    %c0_i32_0 = arith.constant 0 : i32
    %4 = arith.cmpi ne, %3, %c0_i32_0 : i32
    scf.if %4 {
      %c0 = arith.constant 0 : index
      %c0_3 = arith.constant 0 : index
      %c0_4 = arith.constant 0 : index
      %8 = vector.load %arg4[%c0, %c0_3, %c0_4] : memref<1x8x128xf32, #tpu.memory_space<vmem>>, vector<1x8x128xf32>
      %cst = arith.constant 2.000000e+00 : f32
      %9 = vector.broadcast %cst : f32 to vector<1x8x128xf32>
      %10 = arith.mulf %8, %9 : vector<1x8x128xf32>
      %c0_5 = arith.constant 0 : index
      %c0_6 = arith.constant 0 : index
      %c0_7 = arith.constant 0 : index
      %11 = vector.load %arg5[%c0_5, %c0_6, %c0_7] : memref<1x8x128xf32, #tpu.memory_space<vmem>>, vector<1x8x128xf32>
      tpu.vector_store %arg5[%c0_5, %c0_6, %c0_7], %10 {strides = array<i32>} : memref<1x8x128xf32, #tpu.memory_space<vmem>>, vector<1x8x128xf32>,
    } else {
    }
    %c0_i32_1 = arith.constant 0 : i32
    %5 = arith.cmpi eq, %1, %c0_i32_1 : i32
    %6 = arith.extui %5 : i1 to i32
    %c0_i32_2 = arith.constant 0 : i32
    %7 = arith.cmpi ne, %6, %c0_i32_2 : i32
    scf.if %7 {
      %cst = arith.constant 0.000000e+00 : f32
      %8 = vector.broadcast %cst : f32 to vector<1x8x128xf32>
      %c0 = arith.constant 0 : index
      %c0_3 = arith.constant 0 : index
      %c0_4 = arith.constant 0 : index
      %9 = vector.load %arg5[%c0, %c0_3, %c0_4] : memref<1x8x128xf32, #tpu.memory_space<vmem>>, vector<1x8x128xf32>
      tpu.vector_store %arg5[%c0, %c0_3, %c0_4], %8 {strides = array<i32>} : memref<1x8x128xf32, #tpu.memory_space<vmem>>, vector<1x8x128xf32>,
    } else {
    }
    return
  }
  func.func @transform_0(%arg0: i32, %arg1: i32, %arg2: i32, %arg3: memref<2xi32, #tpu.memory_space<smem>>) -> (i32, i32, i32) {
    %0 = arith.index_cast %arg0 : i32 to index
    %1 = memref.load %arg3[%0] : memref<2xi32, #tpu.memory_space<smem>>
    %2 = arith.muli %arg0, %1 : i32
    %3 = arith.muli %arg1, %1 : i32
    %4 = arith.muli %arg2, %1 : i32
    %c0_i32 = arith.constant 0 : i32
    return %2, %3, %4 : i32, i32, i32
  }
  func.func @transform_1(%arg0: i32, %arg1: i32, %arg2: i32, %arg3: memref<2xi32, #tpu.memory_space<smem>>) -> (i32, i32, i32) {
    %c0_i32 = arith.constant 0 : i32
    return %arg0, %arg1, %arg2 : i32, i32, i32
  }
}

</mosaic_0001>

<bundles_post_ra>
// kernel: tpu_custom_call.1
= control target key start
LH: loop header
LB: loop body
LE: loop exit
PB: predicated region body
PF: predicated region fallthrough
CT: control target
= control target key end

     0   :  { %s782_s0 = inlined_call_operand.hbm [shape: s32[2], index: 0, kind: input, shape index: {}]   ;;  %s783_s1 = inlined_call_operand.hbm [shape: f32[2,8,128], index: 1, kind: input, shape index: {}]   ;;  %s784_s2 = inlined_call_operand.hbm [shape: f32[2,8,128], index: 2, kind: output, shape index: {}]  }
   0x1   :  { %s403_s11 = scalar_lea.hbm %s782_s0, 16 }
   0x2   :  { %p404_p0 = scmp.ne.s32.totalorder %s782_s0, %s403_s11  ;;  %p407_p1 = scmp.lt.u32.totalorder %s403_s11, %s782_s0 }
   0x4   :  { %p409_p2 = pnand %p407_p1, %p404_p0 }
   0x6   :  { %412 = shalt.err (!%p409_p2)  }
   0x7   :  { %s553_s16 = smov [#allocation3]  }
   0x8   :  { %8 = dma.hbm_to_smem %s782_s0, 16, %s553_s16, [#allocation2] }
   0x9   :  { %507 = dma.done.wait [#allocation2], 16 }
   0xa   :  { %508 = vsyncadd [#allocation2], 4294967280 }
   0xb   :  { %10 = sfence }
   0xc   :  { %11 = vsyncpa [#allocation5], 0 }
   0xd   :  { %13 = vsyncpa [#allocation5 + $0x1], 0 }
   0xe   :  { %14 = vsyncpa [#allocation6], 0 }
   0xf   :  { %16 = vsyncpa [#allocation6 + $0x1], 0  ;;  %s584_s19 = smov 0   ;;  %s586_s20 = smov 0  }
  0x10   :  { %s588_s21 = smov 0   ;;  %s590_s22 = smov 0  }
  0x11   :  { %s592_s23 = smov 0   ;;  %s594_s24 = smov 0  }
  0x12   :  { %s596_s0 = smov 0   ;;  %s598_s25 = smov 0  }
  0x13   :  { %s600_s26 = smov 0  }
  0x14 LB: > { %s296_s27 = sadd.s32 4294967295, %s551_s26   ;;  %s41_s28 = sadd.s32 1, %s547_s25  ;;  %s551_s26 = sphi %s600_s26, %s22_s26   ;;  %s547_s25 = sphi %s598_s25, %s803_s25   ;;  %s543_s0 = sphi %s596_s0, %s802_s0   ;;  %s539_s24 = sphi %s594_s24, %s801_s24   ;;  %s535_s23 = sphi %s592_s23, %s800_s23   ;;  %s531_s22 = sphi %s590_s22, %s799_s22   ;;  %s527_s21 = sphi %s588_s21, %s798_s21   ;;  %s523_s20 = sphi %s586_s20, %s797_s20   ;;  %s519_s19 = sphi %s584_s19, %s796_s19  }
  0x15   : > { %s45_s29 = sld [smem:[#allocation3 + %s547_s25]]  ;;  %s297_s30 = sadd.s32 4294967294, %s551_s26  }
  0x16   : > { %p43_p3 = scmp.ge.s32.totalorder %s41_s28, 2  ;;  %s60_s3 = sadd.s32 1, %s539_s24 }
  0x17   : > { %p67_p4 = scmp.ne.s32.totalorder %s539_s24, %s535_s23  ;;  %p68_p5 = scmp.eq.s32.totalorder %s551_s26, 0 }
  0x18   : > { %s805_s28 = smov (%p43_p3, %s41_s28), 0  ;;  %p73_p6 = scmp.ne.s32.totalorder %s535_s23, %s531_s22 }
  0x19   : > { %s49_s4 = sld [smem:[#allocation3 + %s805_s28]]  ;;  %p74_p7 = scmp.eq.s32.totalorder %s296_s27, 0 }
  0x1a   : > { %s83_s6 = ssub.s32 %s547_s25, %s805_s28  ;;  %s90_s8 = sadd.s32 1, %s527_s21 }
  0x1b   : > { %s46_s5 = smul.u32 %s547_s25, %s45_s29  ;;  %p642_p8 = por %p74_p7, %p73_p6 }
  0x1c   : > { %p88_p9 = scmp.eq.s32.totalorder %s83_s6, 0  ;;  %p100_p10 = scmp.ne.s32.totalorder %s527_s21, %s523_s20 }
  0x1d   : > { %s787_s7 = scalar_select %p642_p8, 1, 0 }
  0x1e   : > { %s650_s9 = scalar_select %p88_p9, %s527_s21, %s90_s8  }
  0x1f   : > { %p101_p11 = scmp.eq.s32.totalorder %s296_s27, 1  ;;  %p106_p12 = scmp.ne.s32.totalorder %s523_s20, %s519_s19 }
  0x20   : > { %s50_s10 = smul.u32 %s49_s4, %s805_s28  ;;  %p107_p13 = scmp.eq.s32.totalorder %s297_s30, 1 }
  0x21   : > { %p655_p0 = por %p101_p11, %p100_p10  ;;  %p69_p6 = por %p68_p5, %p67_p4 }
  0x22   : > { %s53_s12 = ssub.s32 %s46_s5, %s50_s10  ;;  %p660_p2 = por %p107_p13, %p106_p12 }
  0x23   : > { %s788_s11 = scalar_select %p655_p0, 1, 0 }
  0x24   : > { %s789_s13 = scalar_select %p660_p2, 1, 0 }
  0x25   : > { %p58_p3 = scmp.eq.s32.totalorder %s53_s12, 0  ;;  %p327_p7 = scmp.lt.s32.totalorder %s551_s26, 2 }
  0x26   : > { %s127_s14 = sand.u32 1, %s539_s24   ;;  %p302_p10 = scmp.ge.s32.totalorder %s551_s26, 1 }
  0x27   : > { %s672_s15 = scalar_select %p58_p3, %s539_s24, %s60_s3  }
  0x28   : > { %s300_s16 = sshll.u32 %s127_s14, 3  ;;  %p674_p9 = pnand %p327_p7, %p69_p6 }
  0x29   : > { %s311_s18 = scalar_select %p69_p6, [#allocation3], [#allocation8] }
  0x2a   : > { %s312_s22 = scalar_select %p69_p6, %s547_s25, 0 }
  0x2b   : > { %s807_s18 = smov (!%p327_p7, %s311_s18), [#allocation9]  ;;  %p149_p11 = scmp.lt.s32.totalorder %s551_s26, 3 }
  0x2c   : > { %s809_s22 = smov (!%p327_p7, %s312_s22), 0  ;;  %s131_s30 = scalar_lea.vmem [#allocation4], %s300_s16 }
  0x2d   : > { %s132_s27 = sld [smem:[%s807_s18 + %s809_s22]]  ;;  %p681_p4 = pnand %p302_p10, %p149_p11 }
  0x2e   : > { %s144_s3 = sshll.u32 %s131_s30, 4  ;;  %s128_s12 = scalar_lea.sflag [#allocation5], %s127_s14  ;;  %s686_s3 = int_to_ptr.vmem [resolvable:$true] %s144_s3 }
  0x2f   : > { %p415_p12 = pneg %p674_p9 }
  0x33   : > { %s133_s4 = smul.u32 %s547_s25, %s132_s27  ;;  %s418_s27 = scalar_lea.hbm %s783_s1, 256 }
  0x35   : > { %s301_s5 = sshll.u32 %s133_s4, 7 }
  0x36   : > { %s691_s10 = scalar_lea.hbm %s783_s1, %s301_s5 }
  0x37   : > { %s413_s18 = scalar_lea.hbm %s691_s10, 128  ;;  %p419_p6 = scmp.lt.u32.totalorder %s691_s10, %s783_s1 }
  0x38   : > { %p414_p5 = scmp.ne.s32.totalorder %s691_s10, %s413_s18  ;;  %p420_p7 = scmp.lt.u32.totalorder %s418_s27, %s413_s18 }
  0x39   : > { %p422_p11 = scmp.lt.u32.totalorder %s413_s18, %s691_s10 }
  0x3a   : > { %p416_p13 = pnand %p415_p12, %p414_p5  ;;  %p421_p10 = por %p420_p7, %p419_p6 }
  0x3c   : > { %p417_p3 = pneg %p416_p13  ;;  %p423_p1 = por %p422_p11, %p421_p10 }
  0x3e   : > { %p424_p2 = pnand %p423_p1, %p417_p3 }
  0x40   : > { %427 = shalt.err (!%p424_p2)
}
  0x41   : > { %s428_s14 = scalar_lea.vmem %s686_s3, 128  ;;  %s554_s5 = smov [#allocation4]  }
  0x42   : > { %p429_p5 = scmp.ne.s32.totalorder %s686_s3, %s428_s14  ;;  %s433_s6 = sshll.u32 %s554_s5, 4  ;;  %s434_s6 = int_to_ptr.vmem [resolvable:$false] %s433_s6 }
  0x43   : > { %s435_s8 = scalar_lea.vmem %s434_s6, 256  ;;  %p436_p8 = scmp.lt.s32.totalorder %s686_s3, %s434_s6 }
  0x44   : > { %p431_p13 = pnand %p429_p5, %p415_p12  ;;  %p437_p6 = scmp.lt.s32.totalorder %s435_s8, %s428_s14 }
  0x46   : > { %p432_p0 = pneg %p431_p13  ;;  %p438_p7 = por %p437_p6, %p436_p8 }
  0x48   : > { %p439_p10 = pnand %p438_p7, %p432_p0 }
  0x4a   : > { %442 = shalt.err (!%p439_p10)
}
  0x4b   : > { %322 = dma.hbm_to_vmem [thread:$0]  (!%p674_p9), %s691_s10, 128, %s686_s3, %s128_s12  }
  0x4c   : > { %153 = sbr.rel (%p681_p4) target bundleno = 133 (0x85), region = 24  ;;  %s155_s18 = sand.u32 (!%p681_p4), 1, %s535_s23  }
  0x4d   : > { %s303_s16 = sshll.u32 (!%p681_p4), %s155_s18, 3  ;;  %s156_s22 = scalar_lea.sflag (!%p681_p4), [#allocation5], %s155_s18 }
  0x4e   : > { %s159_s27 = scalar_lea.vmem (!%p681_p4), [#allocation4], %s303_s16  ;;  %p792_p1 = scmp.ne.s32.totalorder (!%p681_p4), %s787_s7, 0 }
  0x53   : > { %510 = dma.done.wait (%p792_p1), %s156_s22, 128  }
  0x54   : > { %512 = vsyncadd (%p792_p1), %s156_s22, 4294967168  ;;  %s175_s17 = sand.u32 1, %s523_s20   ;;  %s182_s30 = sld [smem:[#allocation3 + %s543_s0]] }
  0x55   : > { %s304_s4 = sshll.u32 %s175_s17, 3 }
  0x56   : > { %s177_s3 = scalar_lea.vmem [#allocation7], %s304_s4 }
  0x5a   : > { %p305_p8 = scmp.eq.s32.totalorder %s182_s30, 0 }
  0x5b   : > { %v187_v0 = vld [vmem:[%s159_s27] sm:$0xff] (!%p305_p8) }
  0x5c   : > { %186 = sbr.rel (%p305_p8) target bundleno = 99 (0x63), region = 32  ;;  %v188_v1 = vmul.f32 (!%p305_p8), 2.0, %v187_v0 }
  0x5e   : > { %189 = vst [vmem:[%s177_s3] sm:$0xff] (!%p305_p8), %v188_v1 }
  0x63 PF: > { %p306_p0 = scmp.ne.s32.totalorder %s182_s30, 0 }
  0x64   : > { %v555_v2 = vmov (!%p306_p0), 0.0  }
  0x65   : > { %193 = sbr.rel (%p306_p0) target bundleno = 108 (0x6c), region = 36  ;;  %194 = vst [vmem:[%s177_s3] sm:$0xff] (!%p306_p0), %v555_v2 }
  0x6c PF: > { %s308_s7 = sshll.u32 %s543_s0, 7  ;;  %s211_s14 = sshll.u32 %s177_s3, 4  ;;  %s212_s14 = int_to_ptr.vmem [resolvable:$true] %s211_s14 }
  0x6d   : > { %s731_s12 = scalar_lea.hbm %s784_s2, %s308_s7  ;;  %s196_s5 = scalar_lea.sflag [#allocation6], %s175_s17 }
  0x6e   : > { %s443_s6 = scalar_lea.vmem %s212_s14, 128  ;;  %p793_p9 = scmp.ne.s32.totalorder %s788_s11, 0 }
  0x6f   : > { %p444_p2 = scmp.ne.s32.totalorder %s212_s14, %s443_s6  ;;  %s556_s8 = smov [#allocation7]  }
  0x70   : > { %s447_s18 = sshll.u32 %s556_s8, 4  ;;  %s448_s18 = int_to_ptr.vmem [resolvable:$false] %s447_s18 }
  0x71   : > { %p445_p4 = pnand %p444_p2, %p793_p9  ;;  %s449_s16 = scalar_lea.vmem %s448_s18, 256 }
  0x72   : > { %p450_p3 = scmp.lt.s32.totalorder %s212_s14, %s448_s18  ;;  %p451_p11 = scmp.lt.s32.totalorder %s449_s16, %s443_s6 }
  0x73   : > { %p446_p12 = pneg %p445_p4 }
  0x74   : > { %p452_p5 = por %p451_p11, %p450_p3 }
  0x76   : > { %p453_p13 = pnand %p452_p5, %p446_p12 }
  0x78   : > { %456 = shalt.err (!%p453_p13)
}
  0x79   : > { %s457_s0 = scalar_lea.hbm %s731_s12, 128  ;;  %s461_s17 = scalar_lea.hbm %s784_s2, 256 }
  0x7a   : > { %p458_p6 = scmp.ne.s32.totalorder %s731_s12, %s457_s0  ;;  %p462_p1 = scmp.lt.u32.totalorder %s731_s12, %s784_s2 }
  0x7b   : > { %p463_p8 = scmp.lt.u32.totalorder %s461_s17, %s457_s0  ;;  %p465_p2 = scmp.lt.u32.totalorder %s457_s0, %s731_s12 }
  0x7c   : > { %p459_p7 = pnand %p458_p6, %p793_p9 }
  0x7d   : > { %p464_p0 = por %p463_p8, %p462_p1 }
  0x7e   : > { %p460_p10 = pneg %p459_p7 }
  0x7f   : > { %p466_p4 = por %p465_p2, %p464_p0 }
  0x81   : > { %p467_p12 = pnand %p466_p4, %p460_p10 }
  0x83   : > { %470 = shalt.err (!%p467_p12)
}
  0x84   : > { %315 = dma.vmem_to_hbm [thread:$0]  (%p793_p9), %s212_s14, 128, %s731_s12, %s196_s5  }
  0x85 PF: > { %s223_s3 = sand.u32 1, %s519_s19   ;;  %p794_p3 = scmp.ne.s32.totalorder %s789_s13, 0 }
  0x86   : > { %p795_p11 = scmp.ge.s32.totalorder %s551_s26, 2  ;;  %s224_s7 = scalar_lea.sflag [#allocation6], %s223_s3 }
  0x88   : > { %p324_p5 = pnand %p795_p11, %p794_p3 }
  0x8a   : > { %514 = dma.done.wait (!%p324_p5), %s224_s7, 128  }
  0x8b   : > { %516 = vsyncadd (!%p324_p5), %s224_s7, 4294967168  ;;  %s22_s26 = sadd.s32 1, %s551_s26   ;;  %s796_s19 = smov %s523_s20 }
  0x8c   : > { %p19_p13 = scmp.ge.s32.totalorder %s22_s26, 4   ;;  %s797_s20 = smov %s527_s21 }
  0x8d   : > { %s798_s21 = smov %s650_s9  ;;  %s799_s22 = smov %s535_s23 }
  0x8e   : > { %s800_s23 = smov %s539_s24  ;;  %s801_s24 = smov %s672_s15 }
  0x8f   : > { %s802_s0 = smov %s547_s25  ;;  %s803_s25 = smov %s805_s28 }
  0x90   :  { %21 = sbr.rel (!%p19_p13) target bundleno = 20 (0x14), region = 77 }
  0x97   :  { %229 = vsyncpa [#allocation5], 1 }
  0x98   :  { %231 = vsyncpa [#allocation5 + $0x1], 1 }
  0x99   :  { %232 = vsyncpa [#allocation6], 1 }
  0x9a   :  { %234 = vsyncpa [#allocation6 + $0x1], 1 }

</bundles_post_ra>
